<compile_context>
chip_gen: v6e
topology: v6e:2x2x1
jax: 0.10.0
libtpu: 0.0.40
codegen_flags: <defaults>
</compile_context>

<pallas_src>
import functools

import jax
import jax.numpy as jnp
from jax import lax
from jax.experimental import pallas as pl
from jax.experimental.pallas import tpu as pltpu

NUM_GROUPS = 2
EPS = 1e-5
_MiB = 1024 * 1024


def _dual_groupnorm_kernel(x_ref, scale_ref, o_ref, *, eps, denom, use_mxu_reduce):
    # x_ref: (tm, Cp) tile; scale_ref: (1, Cp) f32 (VMEM-resident); o_ref: (tm, Cp).
    # Cp = 2 * cgp with cgp a multiple of 128 (wrapper pads if needed); `denom`
    # is the TRUE number of channels per group — padded lanes are zero so they
    # drop out of the sums.
    cp = x_ref.shape[1]
    cgp = cp // NUM_GROUPS
    inv_denom = 1.0 / float(denom)
    for g in range(NUM_GROUPS):
        sl = slice(g * cgp, (g + 1) * cgp)
        xg = x_ref[:, sl].astype(jnp.float32)                      # (tm, cgp)
        if use_mxu_reduce:
            # Offload the row reductions to the otherwise-idle MXU (v7x tuning
            # knob if the XLU saturates); HIGHEST keeps f32 accuracy.
            ones = jnp.ones((cgp, 128), jnp.float32)
            s = jnp.dot(xg, ones, preferred_element_type=jnp.float32,
                        precision=lax.Precision.HIGHEST)[:, :1]
            ss = jnp.dot(xg * xg, ones, preferred_element_type=jnp.float32,
                         precision=lax.Precision.HIGHEST)[:, :1]
        else:
            s = jnp.sum(xg, axis=1, keepdims=True)                 # (tm, 1)
            ss = jnp.sum(xg * xg, axis=1, keepdims=True)           # (tm, 1)
        mean = s * inv_denom                                       # (tm, 1)
        var = jnp.maximum(ss * inv_denom - mean * mean, 0.0)       # biased, clamped
        inv = lax.rsqrt(var + eps)                                 # (tm, 1)
        # Re-read the narrow-dtype input for the store: nothing (tm, cgp)-sized
        # in f32 needs to stay live across the reduction.
        # NOTE: on the ragged last grid step the padded rows operate on
        # uninitialized VMEM (possible inf/nan); those rows are masked on
        # writeback, so this is harmless by construction — do not "fix" it.
        xs = x_ref[:, sl].astype(jnp.float32)
        o_ref[:, sl] = ((xs - mean) * inv * scale_ref[:, sl]).astype(o_ref.dtype)


def _round_up(v, m):
    return ((v + m - 1) // m) * m


def _tpu_hw():
    """(vmem_capacity_bytes, tensorcores_per_chip) with conservative fallbacks."""
    vmem = 64 * _MiB                      # conservative default (v7x-sized)
    try:
        info = pltpu.get_tpu_info()
        vmem = int(getattr(info, "vmem_capacity_bytes", vmem))
    except Exception:
        pass
    # v7x is the only generation with 64 MiB VMEM per TensorCore (and 2 TCs/chip).
    cores = 2 if vmem <= 64 * _MiB else 1
    return vmem, cores


def _pick_tile_m(n, c, itemsize, vmem_limit, num_cores):
    """Row tile: sublane-aligned, bounded by an HBM block target and a VMEM budget."""
    sublane = {4: 8, 2: 16, 1: 32}.get(itemsize, 8)
    n_pad = _round_up(n, sublane)

    # HBM target: ~8 MiB per in/out block so per-step DMA time (several us)
    # dwarfs the ~0.35 us per-grid-step overhead on all generations.
    target_block_bytes = 8 * _MiB
    # VMEM: 2x double-buffered (in + out) pipeline blocks plus ~one full-row
    # f32 temporary for the in-kernel statistics; leave headroom in the window.
    budget = vmem_limit - 6 * _MiB
    per_row = 4 * c * itemsize + 4 * c
    tm = min(target_block_bytes // (c * itemsize), budget // per_row)
    tm = max(sublane, (tm // sublane) * sublane)
    tm = min(tm, n_pad)                       # never exceed the (padded) batch

    # Step-count target: v7x megacore wants >=2 pipelined iterations per TC
    # (>=4 steps total); single-TC v5e/v6e only need ~2 steps for prefetch /
    # writeback overlap.  Never shrink blocks below ~2 MiB.
    steps_target = 4 if num_cores >= 2 else 2
    if n_pad >= steps_target * sublane:
        tm_cap = _round_up(pl.cdiv(n, steps_target), sublane)
        if tm_cap * c * itemsize >= 2 * _MiB:
            tm = min(tm, tm_cap)
    return tm


def dual_group_norm_with_scale(x, scale, *, eps=EPS, tile_m=None,
                               use_mxu_reduce=False):
    """x: (N, C); scale: (C,).  Returns scale * GroupNorm_2(x) in x.dtype."""
    if x.ndim != 2:
        # GroupNorm stats for (N, C, *spatial) reduce over spatial dims too, and
        # torch's `scale * norm(x)` (C,) broadcast is only channel-wise for 2-D
        # input; refuse rather than silently computing something else.
        # TODO(synk): add an (N, C, *spatial) path if a well-defined broadcast is specified.
        raise ValueError(f"expected (N, C) input, got shape {x.shape}")
    n, c = x.shape
    if c % NUM_GROUPS != 0:
        raise ValueError("channels must be divisible by num_groups=2")
    cg = c // NUM_GROUPS

    # Keep each group's lane slice a multiple of 128 so per-group stores stay
    # unmasked; padded lanes are zero (drop out of the sums) and are stripped
    # again after the kernel.
    cgp = _round_up(cg, 128)
    scale_f32 = scale.astype(jnp.float32)
    if cgp != cg:
        xp = jnp.zeros((n, cgp - cg), dtype=x.dtype)
        sp = jnp.zeros((cgp - cg,), dtype=jnp.float32)
        x_in = jnp.concatenate([x[:, :cg], xp, x[:, cg:], xp], axis=1)
        scale_in = jnp.concatenate([scale_f32[:cg], sp, scale_f32[cg:], sp])
    else:
        x_in, scale_in = x, scale_f32
    c_in = 2 * cgp

    itemsize = jnp.dtype(x.dtype).itemsize
    vmem_cap, num_cores = _tpu_hw()
    # Scoped-VMEM window: stay well inside v7x's 64 MiB physical VMEM; use a
    # larger window on v5e/v6e (128 MiB physical; v5e's default scoped window
    # is only 16 MiB, hence the explicit limit is always set).
    vmem_limit = 48 * _MiB if vmem_cap <= 64 * _MiB else 64 * _MiB
    if tile_m is None:
        tile_m = _pick_tile_m(n, c_in, itemsize, vmem_limit, num_cores)

    kernel = functools.partial(_dual_groupnorm_kernel, eps=eps, denom=cg,
                               use_mxu_reduce=use_mxu_reduce)
    out = pl.pallas_call(
        kernel,
        out_shape=jax.ShapeDtypeStruct((n, c_in), x.dtype),
        grid_spec=pl.GridSpec(
            grid=(pl.cdiv(n, tile_m),),
            in_specs=[
                pl.BlockSpec((tile_m, c_in), lambda i: (i, 0)),
                pl.BlockSpec((1, c_in), lambda i: (0, 0)),   # VMEM-resident scale
            ],
            out_specs=pl.BlockSpec((tile_m, c_in), lambda i: (i, 0)),
        ),
        compiler_params=pltpu.CompilerParams(
            dimension_semantics=("parallel",),
            vmem_limit_bytes=vmem_limit,
        ),
    )(x_in, scale_in.reshape(1, c_in))

    if cgp != cg:
        out = jnp.concatenate([out[:, :cg], out[:, cgp:cgp + cg]], axis=1)
    return out


def _reference(x, scale, eps=EPS):
    n, c = x.shape
    cg = c // NUM_GROUPS
    xg = x.reshape(n, NUM_GROUPS, cg).astype(jnp.float32)
    mean = jnp.mean(xg, axis=2, keepdims=True)
    var = jnp.mean((xg - mean) ** 2, axis=2, keepdims=True)
    y = ((xg - mean) / jnp.sqrt(var + eps)).reshape(n, c)
    return scale[None, :].astype(jnp.float32) * y


if __name__ == "__main__":
    key = jax.random.PRNGKey(0)
    kx, ks, kx2, ks2 = jax.random.split(key, 4)

    # Case 1: lane-aligned groups (C=256 -> cg=128), the fast path.
    N, C = 16, 256
    x = jax.random.normal(kx, (N, C), dtype=jnp.float32)
    # Module init is torch.ones(C); perturb slightly so scale actually matters.
    scale = jnp.ones((C,), jnp.float32) + 0.1 * jax.random.normal(ks, (C,), jnp.float32)
    out = jax.block_until_ready(dual_group_norm_with_scale(x, scale))
    ref = _reference(x, scale)
    assert out.shape == (N, C)
    assert jnp.max(jnp.abs(out - ref)) < 1e-4, "mismatch vs reference (aligned C)"

    # Case 2: non-128-aligned groups (C=96 -> cg=48), exercises the padding path.
    N2, C2 = 16, 96
    x2 = jax.random.normal(kx2, (N2, C2), dtype=jnp.float32)
    scale2 = jnp.ones((C2,), jnp.float32) + 0.1 * jax.random.normal(ks2, (C2,), jnp.float32)
    out2 = jax.block_until_ready(dual_group_norm_with_scale(x2, scale2))
    ref2 = _reference(x2, scale2)
    assert out2.shape == (N2, C2)
    assert jnp.max(jnp.abs(out2 - ref2)) < 1e-4, "mismatch vs reference (padded C)"

    print("KERNEL_OK")
</pallas_src>

<mosaic_0001>
module attributes {stable_mosaic.version = 11 : i64} {
  func.func @_dual_groupnorm_kernel(%arg0: i32, %arg1: memref<16x256xf32, #tpu.memory_space<vmem>>, %arg2: memref<1x256xf32, #tpu.memory_space<vmem>>, %arg3: memref<16x256xf32, #tpu.memory_space<vmem>>) attributes {dimension_semantics = [#tpu.dimension_semantics<parallel>], iteration_bounds = array<i64: 1>, scalar_prefetch = 0 : i64, scratch_operands = 0 : i64, tpu.core_type = #tpu.core_type<tc>, window_params = [{transform_indices = @transform_0, window_bounds = array<i64: 16, 256>}, {pipeline_mode = #tpu.pipeline_mode<synchronous>, transform_indices = @transform_1, window_bounds = array<i64: 1, 256>}, {transform_indices = @transform_2, window_bounds = array<i64: 16, 256>}]} {
    %c0 = arith.constant 0 : index
    %c0_0 = arith.constant 0 : index
    %0 = vector.load %arg1[%c0, %c0_0] : memref<16x256xf32, #tpu.memory_space<vmem>>, vector<16x128xf32>
    %cst = arith.constant dense<0.000000e+00> : vector<16xf32>
    %1 = vector.multi_reduction <add>, %0, %cst [1] : vector<16x128xf32> to vector<16xf32>
    %2 = vector.shape_cast %1 : vector<16xf32> to vector<16x1xf32>
    %3 = arith.mulf %0, %0 : vector<16x128xf32>
    %cst_1 = arith.constant dense<0.000000e+00> : vector<16xf32>
    %4 = vector.multi_reduction <add>, %3, %cst_1 [1] : vector<16x128xf32> to vector<16xf32>
    %5 = vector.shape_cast %4 : vector<16xf32> to vector<16x1xf32>
    %cst_2 = arith.constant 7.812500e-03 : f32
    %6 = vector.broadcast %cst_2 : f32 to vector<16x1xf32>
    %7 = arith.mulf %2, %6 : vector<16x1xf32>
    %cst_3 = arith.constant 7.812500e-03 : f32
    %8 = vector.broadcast %cst_3 : f32 to vector<16x1xf32>
    %9 = arith.mulf %5, %8 : vector<16x1xf32>
    %10 = arith.mulf %7, %7 : vector<16x1xf32>
    %11 = arith.subf %9, %10 : vector<16x1xf32>
    %cst_4 = arith.constant 0.000000e+00 : f32
    %12 = vector.broadcast %cst_4 : f32 to vector<16x1xf32>
    %13 = arith.maximumf %11, %12 : vector<16x1xf32>
    %cst_5 = arith.constant 9.99999974E-6 : f32
    %14 = vector.broadcast %cst_5 : f32 to vector<16x1xf32>
    %15 = arith.addf %13, %14 : vector<16x1xf32>
    %16 = math.rsqrt %15 : vector<16x1xf32>
    %c0_6 = arith.constant 0 : index
    %c0_7 = arith.constant 0 : index
    %17 = vector.load %arg1[%c0_6, %c0_7] : memref<16x256xf32, #tpu.memory_space<vmem>>, vector<16x128xf32>
    %18 = vector.broadcast %7 : vector<16x1xf32> to vector<16x128xf32>
    %19 = arith.subf %17, %18 : vector<16x128xf32>
    %20 = vector.broadcast %16 : vector<16x1xf32> to vector<16x128xf32>
    %21 = arith.mulf %19, %20 : vector<16x128xf32>
    %c0_8 = arith.constant 0 : index
    %c0_9 = arith.constant 0 : index
    %22 = vector.load %arg2[%c0_8, %c0_9] : memref<1x256xf32, #tpu.memory_space<vmem>>, vector<1x128xf32>
    %23 = vector.broadcast %22 : vector<1x128xf32> to vector<16x128xf32>
    %24 = arith.mulf %21, %23 : vector<16x128xf32>
    %c0_10 = arith.constant 0 : index
    %c0_11 = arith.constant 0 : index
    %25 = vector.load %arg3[%c0_10, %c0_11] : memref<16x256xf32, #tpu.memory_space<vmem>>, vector<16x128xf32>
    tpu.vector_store %arg3[%c0_10, %c0_11], %24 {strides = array<i32>} : memref<16x256xf32, #tpu.memory_space<vmem>>, vector<16x128xf32>,
    %c0_12 = arith.constant 0 : index
    %c128 = arith.constant 128 : index
    %26 = vector.load %arg1[%c0_12, %c128] : memref<16x256xf32, #tpu.memory_space<vmem>>, vector<16x128xf32>
    %cst_13 = arith.constant dense<0.000000e+00> : vector<16xf32>
    %27 = vector.multi_reduction <add>, %26, %cst_13 [1] : vector<16x128xf32> to vector<16xf32>
    %28 = vector.shape_cast %27 : vector<16xf32> to vector<16x1xf32>
    %29 = arith.mulf %26, %26 : vector<16x128xf32>
    %cst_14 = arith.constant dense<0.000000e+00> : vector<16xf32>
    %30 = vector.multi_reduction <add>, %29, %cst_14 [1] : vector<16x128xf32> to vector<16xf32>
    %31 = vector.shape_cast %30 : vector<16xf32> to vector<16x1xf32>
    %cst_15 = arith.constant 7.812500e-03 : f32
    %32 = vector.broadcast %cst_15 : f32 to vector<16x1xf32>
    %33 = arith.mulf %28, %32 : vector<16x1xf32>
    %cst_16 = arith.constant 7.812500e-03 : f32
    %34 = vector.broadcast %cst_16 : f32 to vector<16x1xf32>
    %35 = arith.mulf %31, %34 : vector<16x1xf32>
    %36 = arith.mulf %33, %33 : vector<16x1xf32>
    %37 = arith.subf %35, %36 : vector<16x1xf32>
    %cst_17 = arith.constant 0.000000e+00 : f32
    %38 = vector.broadcast %cst_17 : f32 to vector<16x1xf32>
    %39 = arith.maximumf %37, %38 : vector<16x1xf32>
    %cst_18 = arith.constant 9.99999974E-6 : f32
    %40 = vector.broadcast %cst_18 : f32 to vector<16x1xf32>
    %41 = arith.addf %39, %40 : vector<16x1xf32>
    %42 = math.rsqrt %41 : vector<16x1xf32>
    %c0_19 = arith.constant 0 : index
    %c128_20 = arith.constant 128 : index
    %43 = vector.load %arg1[%c0_19, %c128_20] : memref<16x256xf32, #tpu.memory_space<vmem>>, vector<16x128xf32>
    %44 = vector.broadcast %33 : vector<16x1xf32> to vector<16x128xf32>
    %45 = arith.subf %43, %44 : vector<16x128xf32>
    %46 = vector.broadcast %42 : vector<16x1xf32> to vector<16x128xf32>
    %47 = arith.mulf %45, %46 : vector<16x128xf32>
    %c0_21 = arith.constant 0 : index
    %c128_22 = arith.constant 128 : index
    %48 = vector.load %arg2[%c0_21, %c128_22] : memref<1x256xf32, #tpu.memory_space<vmem>>, vector<1x128xf32>
    %49 = vector.broadcast %48 : vector<1x128xf32> to vector<16x128xf32>
    %50 = arith.mulf %47, %49 : vector<16x128xf32>
    %c0_23 = arith.constant 0 : index
    %c128_24 = arith.constant 128 : index
    %51 = vector.load %arg3[%c0_23, %c128_24] : memref<16x256xf32, #tpu.memory_space<vmem>>, vector<16x128xf32>
    tpu.vector_store %arg3[%c0_23, %c128_24], %50 {strides = array<i32>} : memref<16x256xf32, #tpu.memory_space<vmem>>, vector<16x128xf32>,
    return
  }
  func.func @transform_0(%arg0: i32) -> (i32, i32) {
    %c0_i32 = arith.constant 0 : i32
    %c0_i32_0 = arith.constant 0 : i32
    return %arg0, %c0_i32 : i32, i32
  }
  func.func @transform_1(%arg0: i32) -> (i32, i32) {
    %c0_i32 = arith.constant 0 : i32
    %c0_i32_0 = arith.constant 0 : i32
    %c0_i32_1 = arith.constant 0 : i32
    return %c0_i32, %c0_i32_0 : i32, i32
  }
  func.func @transform_2(%arg0: i32) -> (i32, i32) {
    %c0_i32 = arith.constant 0 : i32
    %c0_i32_0 = arith.constant 0 : i32
    return %arg0, %c0_i32 : i32, i32
  }
}

</mosaic_0001>

<bundles_post_ra>
// kernel: tpu_custom_call.1
= control target key start
LH: loop header
LB: loop body
LE: loop exit
PB: predicated region body
PF: predicated region fallthrough
CT: control target
= control target key end

     0   :  { %7 = vsyncpa [#allocation3], 0  ;;  %s266_s0 = inlined_call_operand.hbm [shape: f32[16,256], index: 0, kind: input, shape index: {}]   ;;  %s267_s1 = inlined_call_operand.hbm [shape: f32[1,256], index: 1, kind: input, shape index: {}]   ;;  %s268_s2 = inlined_call_operand.hbm [shape: f32[16,256], index: 2, kind: output, shape index: {}]  }
   0x1   :  { %8 = vsyncpa [#allocation6], 0 }
   0x2   :  { %9 = vsyncpa [#allocation4], 0  ;;  %s219_s9 = smov [#allocation2]  }
   0x3   :  { %s15_s10 = sshll.u32 %s219_s9, 4  ;;  %s16_s10 = int_to_ptr.vmem [resolvable:$true] %s15_s10 }
   0x4   :  { %s161_s11 = scalar_lea.vmem %s16_s10, 512  ;;  %p166_p1 = scmp.lt.s32.totalorder %s16_s10, %s16_s10 }
   0x5   :  { %p162_p0 = scmp.ne.s32.totalorder %s16_s10, %s161_s11  ;;  %p167_p2 = scmp.lt.s32.totalorder %s161_s11, %s161_s11 }
   0x7   :  { %p168_p3 = por %p167_p2, %p166_p1 }
   0x9   :  { %p169_p4 = pnand %p168_p3, %p162_p0 }
   0xb   :  { %172 = shalt.err (!%p169_p4)
}
   0xc   :  { %s220_s12 = smov 256   ;;  %s221_s13 = smov 16  }
   0xd   :  { %21 = dma.hbm_to_vmem [thread:$0]  %s266_s0, 512, %s16_s10, [#allocation3], %s220_s12, %s220_s12, %s221_s13  }
   0xe   :  { %s222_s16 = smov [#allocation5]  }
   0xf   :  { %s28_s17 = sshll.u32 %s222_s16, 4  ;;  %s29_s17 = int_to_ptr.vmem [resolvable:$true] %s28_s17 }
  0x10   :  { %s181_s18 = scalar_lea.vmem %s29_s17, 32  ;;  %p186_p6 = scmp.lt.s32.totalorder %s29_s17, %s29_s17 }
  0x11   :  { %p182_p5 = scmp.ne.s32.totalorder %s29_s17, %s181_s18  ;;  %p187_p7 = scmp.lt.s32.totalorder %s181_s18, %s181_s18 }
  0x13   :  { %p188_p8 = por %p187_p7, %p186_p6 }
  0x15   :  { %p189_p9 = pnand %p188_p8, %p182_p5 }
  0x17   :  { %192 = shalt.err (!%p189_p9)
}
  0x18   :  { %31 = dma.hbm_to_vmem [thread:$0]  %s267_s1, 32, %s29_s17, [#allocation6]  }
  0x19   :  { %213 = dma.done.wait [#allocation3], 512  }
  0x1a   :  { %214 = vsyncadd [#allocation3], 4294966784 }
  0x1b   :  { %215 = dma.done.wait [#allocation6], 32  }
  0x1c   :  { %216 = vsyncadd [#allocation6], 4294967264  ;;  %v248_v0 = vld [vmem:[#allocation2 + $0x8] sm:$0xff]  ;;  %v38_v1 = vld [vmem:[#allocation2] sm:$0xff]  ;;  %s223_s0 = smov [#allocation7]  }
  0x1d   :  { %81 = vadd.xlane.f32.xlu1 %v248_v0  ;;  %40 = vadd.xlane.f32.xlu0 %v38_v1  ;;  %v251_v2 = vld [vmem:[#allocation2 + $0x18] sm:$0xff]  ;;  %v39_v3 = vld [vmem:[#allocation2 + $0x10] sm:$0xff]  ;;  %v44_v5 = vmul.f32 %v38_v1, %v38_v1  ;;  %v85_v7 = vmul.f32 %v248_v0, %v248_v0  ;;  %v138_v43 = vld [vmem:[#allocation5] ss:$0 sm:$0xff]  ;;  %s125_s1 = sshll.u32 %s223_s0, 4  ;;  %s126_s1 = int_to_ptr.vmem [resolvable:$true] %s125_s1 }
  0x1e   :  { %v45_v4 = vmul.f32 %v39_v3, %v39_v3  ;;  %v86_v6 = vmul.f32 %v251_v2, %v251_v2  ;;  %v139_v52 = vld [vmem:[#allocation5 + $0x1] ss:$0 sm:$0xff]  ;;  %s193_s21 = scalar_lea.vmem %s126_s1, 512  ;;  %p198_p11 = scmp.lt.s32.totalorder %s126_s1, %s126_s1 }
  0x1f   :  { %p194_p10 = scmp.ne.s32.totalorder %s126_s1, %s193_s21  ;;  %p199_p12 = scmp.lt.s32.totalorder %s193_s21, %s193_s21 }
  0x21   :  { %83 = vadd.xlane.f32.xlu1 %v251_v2  ;;  %42 = vadd.xlane.f32.xlu0 %v39_v3  ;;  %p200_p13 = por %p199_p12, %p198_p11 }
  0x23   :  { %p201_p0 = pnand %p200_p13, %p194_p10 }
  0x25   :  { %48 = vadd.xlane.f32.xlu1 %v45_v4  ;;  %46 = vadd.xlane.f32.xlu0 %v44_v5 }
  0x29   :  { %89 = vadd.xlane.f32.xlu1 %v86_v6  ;;  %87 = vadd.xlane.f32.xlu0 %v85_v7 }
  0xa6   :  { %v82_v8 = vpop.xlane.xlu1 %81  ;;  %v41_v9 = vpop.xlane.xlu0 %40 }
  0xa7   :  { %v50_v12 = vmul.f32 0.0078125, %v41_v9  ;;  %v91_v14 = vmul.f32 0.0078125, %v82_v8 }
  0xa9   :  { %v54_v18 = vmul.f32 %v50_v12, %v50_v12  ;;  %v95_v24 = vmul.f32 %v91_v14, %v91_v14  ;;  %v64_v42 = vsub.f32 %v38_v1, %v50_v12  ;;  %v105_v50 = vsub.f32 %v248_v0, %v91_v14 }
  0xaa   :  { %v84_v10 = vpop.xlane.xlu1 %83  ;;  %v43_v11 = vpop.xlane.xlu0 %42 }
  0xab   :  { %v51_v13 = vmul.f32 0.0078125, %v43_v11  ;;  %v92_v15 = vmul.f32 0.0078125, %v84_v10 }
  0xad   :  { %v55_v19 = vmul.f32 %v51_v13, %v51_v13  ;;  %v96_v25 = vmul.f32 %v92_v15, %v92_v15  ;;  %v65_v40 = vsub.f32 %v39_v3, %v51_v13  ;;  %v106_v47 = vsub.f32 %v251_v2, %v92_v15 }
  0xae   :  { %v49_v16 = vpop.xlane.xlu1 %48  ;;  %v47_v17 = vpop.xlane.xlu0 %46 }
  0xaf   :  { %v53_v20 = vmul.f32 0.0078125, %v49_v16  ;;  %v52_v21 = vmul.f32 0.0078125, %v47_v17 }
  0xb1   :  { %v57_v22 = vsub.f32 %v53_v20, %v55_v19  ;;  %v56_v23 = vsub.f32 %v52_v21, %v54_v18 }
  0xb2   :  { %v90_v26 = vpop.xlane.xlu1 %89  ;;  %v88_v27 = vpop.xlane.xlu0 %87 }
  0xb3   :  { %v59_v28 = vmax.f32 %v57_v22, 0.0  ;;  %v58_v29 = vmax.f32 %v56_v23, 0.0  ;;  %v94_v30 = vmul.f32 0.0078125, %v90_v26  ;;  %v93_v31 = vmul.f32 0.0078125, %v88_v27 }
  0xb5   :  { %v61_v32 = vadd.f32 1e-05, %v59_v28  ;;  %v60_v33 = vadd.f32 1e-05, %v58_v29  ;;  %v98_v34 = vsub.f32 %v94_v30, %v96_v25  ;;  %v97_v35 = vsub.f32 %v93_v31, %v95_v24 }
  0xb7   :  { %145 = vrsqrt.f32 %v61_v32  ;;  %v100_v36 = vmax.f32 %v98_v34, 0.0  ;;  %v99_v37 = vmax.f32 %v97_v35, 0.0 }
  0xb8   :  { %147 = vrsqrt.f32 %v60_v33 }
  0xb9   :  { %v102_v38 = vadd.f32 1e-05, %v100_v36  ;;  %v101_v39 = vadd.f32 1e-05, %v99_v37 }
  0xbb   :  { %149 = vrsqrt.f32 %v102_v38 }
  0xbc   :  { %151 = vrsqrt.f32 %v101_v39 }
  0xc4   :  { %v146_v41 = vpop.eup %145 }
  0xc5   :  { %v148_v44 = vpop.eup %147  ;;  %v67_v45 = vmul.f32 %v146_v41, %v65_v40 }
  0xc6   :  { %v66_v46 = vmul.f32 %v148_v44, %v64_v42 }
  0xc7   :  { %v76_v48 = vmul.f32 %v138_v43, %v67_v45 }
  0xc8   :  { %v150_v49 = vpop.eup %149  ;;  %v75_v51 = vmul.f32 %v138_v43, %v66_v46 }
  0xc9   :  { %v152_v53 = vpop.eup %151  ;;  %78 = vst [vmem:[#allocation7 + $0x10] sm:$0xff] %v76_v48  ;;  %v108_v54 = vmul.f32 %v150_v49, %v106_v47 }
  0xca   :  { %77 = vst [vmem:[#allocation7] sm:$0xff] %v75_v51  ;;  %v107_v55 = vmul.f32 %v152_v53, %v105_v50 }
  0xcb   :  { %v117_v56 = vmul.f32 %v139_v52, %v108_v54 }
  0xcc   :  { %v116_v57 = vmul.f32 %v139_v52, %v107_v55 }
  0xcd   :  { %119 = vst [vmem:[#allocation7 + $0x18] sm:$0xff] %v117_v56 }
  0xce   :  { %118 = vst [vmem:[#allocation7 + $0x8] sm:$0xff] %v116_v57 }
  0xcf   :  { %204 = shalt.err (!%p201_p0)
}
  0xd0   :  { %131 = dma.vmem_to_hbm [thread:$0]  %s126_s1, 512, %s268_s2, [#allocation4], %s220_s12, %s220_s12, %s221_s13  }
  0xd1   :  { %217 = dma.done.wait [#allocation4], 512  }
  0xd2   :  { %218 = vsyncadd [#allocation4], 4294966784 }
  0xd3   :  { %135 = vsyncpa [#allocation3], 1 }
  0xd4   :  { %136 = vsyncpa [#allocation6], 1 }
  0xd5   :  { %137 = vsyncpa [#allocation4], 1 }

</bundles_post_ra>
